<compile_context>
chip_gen: v6e
topology: v6e:2x2x1
jax: 0.10.0
libtpu: 0.0.40
codegen_flags: <defaults>
</compile_context>

<pallas_src>
import functools
import math

import jax
import jax.numpy as jnp
from jax.experimental import pallas as pl
from jax.experimental.pallas import tpu as pltpu


# ------------------------------- kernel --------------------------------------

def _gelu_tanh(x):
    # GELU(approximate='tanh'): 0.5*x*(1 + tanh(sqrt(2/pi)*(x + 0.044715*x^3)))
    c = math.sqrt(2.0 / math.pi)
    return 0.5 * x * (1.0 + jnp.tanh(c * (x + 0.044715 * x * x * x)))


def _autoencoder_kernel(x_ref, w_ref, b_ref, o_ref, *, num_layers, matmul_dtype):
    """Fused encoder -> bottleneck -> decoder over one batch tile.

    x_ref : [TB, d_in]   unpadded input tile (d_in = full array width)
    w_ref : [L, D, D]    zero-padded stacked weights in `matmul_dtype`
                         (constant index_map -> DMA'd once, stays resident)
    b_ref : [L, 1, D]    zero-padded stacked biases (f32; epilogue is f32)
    o_ref : [TB, D]      lane-dense (D = multiple of 128) reconstruction tile
    """
    dmax = w_ref.shape[-1]
    d_in = x_ref.shape[-1]

    h = x_ref[...].astype(jnp.float32)                      # [TB, d_in]

    # If the input width is not sublane-aligned for the matmul dtype, zero-pad
    # it to the full lane-dense width (padded weight rows are zero => exact).
    sublane = 8 if jnp.dtype(matmul_dtype).itemsize == 4 else 16
    if d_in != dmax and d_in % sublane != 0:
        h = jnp.pad(h, ((0, 0), (0, dmax - d_in)))

    for l in range(num_layers):          # static unroll: L is a trace-time const
        w = w_ref[l]                                        # [D, D], matmul dtype
        if l == 0 and h.shape[-1] != dmax:
            w = w[: h.shape[-1], :]      # static slice: first matmul uses K=d_in
        lhs = h if h.dtype == matmul_dtype else h.astype(matmul_dtype)
        y = jnp.dot(lhs, w, preferred_element_type=jnp.float32)   # f32 accumulate
        y = y + b_ref[l]                 # (1, D) f32 bias broadcasts over the tile
        if l < num_layers - 1:           # final Linear has no activation
            y = _gelu_tanh(y)            # f32 epilogue (tanh on EUP)
        h = y
    o_ref[...] = h.astype(o_ref.dtype)


# --------------------------- parameter handling -------------------------------

def _round_up(x, m):
    return ((x + m - 1) // m) * m


def init_linear_params(key, d_in, d_out, dtype=jnp.float32):
    """Deterministic init mimicking torch.nn.Linear (uniform +/- 1/sqrt(d_in))."""
    kw, kb = jax.random.split(key)
    bound = 1.0 / math.sqrt(d_in)
    w = jax.random.uniform(kw, (d_in, d_out), dtype=dtype, minval=-bound, maxval=bound)
    b = jax.random.uniform(kb, (d_out,), dtype=dtype, minval=-bound, maxval=bound)
    return w, b


def init_autoencoder_params(key, hparams, dtype=jnp.float32):
    """Returns a list of (w, b, apply_gelu) tuples covering encoder + decoder."""
    input_dim = hparams["INPUT_DIM"]
    enc_hidden = hparams["HIDDEN_DIMS_ENCODER"]
    bottleneck = hparams["BOTTLENECK_DIM"]
    dec_hidden = hparams["HIDDEN_DIMS_DECODER"]

    layers = []  # (d_in, d_out, apply_gelu)
    in_dim = input_dim
    for h in enc_hidden:                       # encoder hidden: Linear + GELU
        layers.append((in_dim, h, True))
        in_dim = h
    layers.append((in_dim, bottleneck, True))  # bottleneck: Linear + GELU
    in_dim = bottleneck
    for h in dec_hidden:                       # decoder hidden: Linear + GELU
        layers.append((in_dim, h, True))
        in_dim = h
    layers.append((in_dim, input_dim, False))  # final Linear (no activation)

    params = []
    keys = jax.random.split(key, len(layers))
    for k, (d_in, d_out, act) in zip(keys, layers):
        w, b = init_linear_params(k, d_in, d_out, dtype)
        params.append((w, b, act))
    return params


def pack_autoencoder_params(params, matmul_dtype=jnp.bfloat16):
    """Zero-pad every layer to a common lane-dense width and stack.

    Weights are packed in `matmul_dtype` (bf16 by default: MXU-native on all
    generations, halves the weight DMA); biases stay f32 because the bias+GELU
    epilogue runs in f32.  Padding is exact: padded weight rows/cols and bias
    entries are zero and GELU(0) = 0, so padded feature columns stay zero.

    Returns (w_stack [L, D, D] matmul_dtype, b_stack [L, 1, D] f32), D % 128 == 0.
    """
    num_layers = len(params)
    dmax = 128
    for w, _, _ in params:
        dmax = max(dmax, _round_up(w.shape[0], 128), _round_up(w.shape[1], 128))

    w_stack = jnp.zeros((num_layers, dmax, dmax), matmul_dtype)
    b_stack = jnp.zeros((num_layers, 1, dmax), jnp.float32)
    for l, (w, b, _) in enumerate(params):
        w_stack = w_stack.at[l, : w.shape[0], : w.shape[1]].set(w.astype(matmul_dtype))
        b_stack = b_stack.at[l, 0, : b.shape[0]].set(b.astype(jnp.float32))
    return w_stack, b_stack


# ------------------------------- forward --------------------------------------

def autoencoder_forward(w_stack, b_stack, x, *, input_dim, batch_tile=1024):
    """Full AutoEncoder forward as a single fused Pallas call."""
    B, d_in = x.shape
    num_layers, dmax, _ = w_stack.shape
    assert d_in == input_dim

    # Balanced batch tiling: minimize dead padded rows, tb a multiple of 8,
    # and >= 2 grid steps when B allows so the "parallel" axis shards across
    # both TensorCores on v7x (harmless on single-TC v5e/v6e).
    num_tiles = max(pl.cdiv(B, batch_tile), 2 if B >= 16 else 1)
    tb = _round_up(pl.cdiv(B, num_tiles), 8)
    b_pad = tb * num_tiles
    x_in = x if b_pad == B else jnp.pad(x, ((0, b_pad - B), (0, 0)))

    itemsize_w = jnp.dtype(w_stack.dtype).itemsize
    cost = pl.CostEstimate(
        flops=int(2 * b_pad * dmax * dmax * num_layers),
        transcendentals=int(b_pad * dmax * (num_layers - 1)),
        bytes_accessed=int(
            w_stack.size * itemsize_w
            + b_stack.size * 4
            + x_in.size * jnp.dtype(x_in.dtype).itemsize
            + b_pad * dmax * jnp.dtype(x.dtype).itemsize
        ),
    )

    kernel = functools.partial(
        _autoencoder_kernel, num_layers=num_layers, matmul_dtype=w_stack.dtype
    )
    out_pad = pl.pallas_call(
        kernel,
        out_shape=jax.ShapeDtypeStruct((b_pad, dmax), x.dtype),
        grid=(num_tiles,),
        in_specs=[
            pl.BlockSpec((tb, d_in), lambda i: (i, 0)),                   # x tile (unpadded lanes)
            pl.BlockSpec((num_layers, dmax, dmax), lambda i: (0, 0, 0)),  # weights (resident)
            pl.BlockSpec((num_layers, 1, dmax), lambda i: (0, 0, 0)),     # biases  (resident)
        ],
        out_specs=pl.BlockSpec((tb, dmax), lambda i: (i, 0)),
        compiler_params=pltpu.CompilerParams(
            dimension_semantics=("parallel",),   # megacore sharding on v7x
        ),
        cost_estimate=cost,
    )(x_in, w_stack, b_stack)

    return out_pad[:B, :input_dim]


def reference_forward(params, x):
    """Pure-JAX reference (same math as the PyTorch module)."""
    h = x.astype(jnp.float32)
    for w, b, apply_gelu in params:
        h = h @ w + b
        if apply_gelu:
            h = _gelu_tanh(h)
    return h


# --------------------------------- main ---------------------------------------

if __name__ == "__main__":
    hparams = {
        "INPUT_DIM": 64,
        "HIDDEN_DIMS_ENCODER": [128, 64],
        "BOTTLENECK_DIM": 32,
        "HIDDEN_DIMS_DECODER": [64, 128],
        "HUGGINGFACE_MODEL_NAME": None,
    }
    # TODO(synk): HUGGINGFACE_MODEL_NAME only triggers a print/model load in
    # __init__ of the PyTorch module; it has no effect on the forward pass.

    key = jax.random.PRNGKey(0)
    k_params, k_x = jax.random.split(key)

    params = init_autoencoder_params(k_params, hparams)

    batch = 8
    x = jax.random.normal(k_x, (batch, hparams["INPUT_DIM"]), dtype=jnp.float32)
    x_ref = reference_forward(params, x)

    # Exact f32 path (tight check).
    w32, b32 = pack_autoencoder_params(params, matmul_dtype=jnp.float32)
    y32 = jax.block_until_ready(
        autoencoder_forward(w32, b32, x, input_dim=hparams["INPUT_DIM"])
    )
    assert y32.shape == (batch, hparams["INPUT_DIM"])
    assert y32.dtype == jnp.float32
    assert jnp.allclose(y32, x_ref, rtol=1e-3, atol=1e-3), (
        float(jnp.max(jnp.abs(y32 - x_ref)))
    )

    # Default fast path: bf16 MXU inputs, f32 accumulate + f32 bias/GELU epilogue.
    wbf, bbf = pack_autoencoder_params(params, matmul_dtype=jnp.bfloat16)
    ybf = jax.block_until_ready(
        autoencoder_forward(wbf, bbf, x, input_dim=hparams["INPUT_DIM"])
    )
    assert ybf.shape == (batch, hparams["INPUT_DIM"])
    assert jnp.allclose(ybf, x_ref, rtol=5e-2, atol=5e-2), (
        float(jnp.max(jnp.abs(ybf - x_ref)))
    )

    print("KERNEL_OK")
</pallas_src>

<mosaic_0001>
module attributes {stable_mosaic.version = 11 : i64} {
  func.func @_autoencoder_kernel(%arg0: i32, %arg1: memref<8x64xf32, #tpu.memory_space<vmem>>, %arg2: memref<6x128x128xf32, #tpu.memory_space<vmem>>, %arg3: memref<6x1x128xf32, #tpu.memory_space<vmem>>, %arg4: memref<8x128xf32, #tpu.memory_space<vmem>>) attributes {dimension_semantics = [#tpu.dimension_semantics<parallel>], iteration_bounds = array<i64: 1>, scalar_prefetch = 0 : i64, scratch_operands = 0 : i64, tpu.core_type = #tpu.core_type<tc>, window_params = [{transform_indices = @transform_0, window_bounds = array<i64: 8, 64>}, {pipeline_mode = #tpu.pipeline_mode<synchronous>, transform_indices = @transform_1, window_bounds = array<i64: 6, 128, 128>}, {pipeline_mode = #tpu.pipeline_mode<synchronous>, transform_indices = @transform_2, window_bounds = array<i64: 6, 1, 128>}, {transform_indices = @transform_3, window_bounds = array<i64: 8, 128>}]} {
    %c0 = arith.constant 0 : index
    %c0_0 = arith.constant 0 : index
    %0 = vector.load %arg1[%c0, %c0_0] : memref<8x64xf32, #tpu.memory_space<vmem>>, vector<8x64xf32>
    %c0_1 = arith.constant 0 : index
    %c0_2 = arith.constant 0 : index
    %c0_3 = arith.constant 0 : index
    %1 = vector.load %arg2[%c0_1, %c0_2, %c0_3] : memref<6x128x128xf32, #tpu.memory_space<vmem>>, vector<1x128x128xf32>
    %2 = vector.shape_cast %1 : vector<1x128x128xf32> to vector<128x128xf32>
    %3 = vector.extract_strided_slice %2 {offsets = [0, 0], sizes = [64, 128], strides = [1, 1]} : vector<128x128xf32> to vector<64x128xf32>
    %cst = arith.constant dense<0.000000e+00> : vector<8x128xf32>
    %4 = tpu.matmul %0, %3, %cst {dimension_numbers = #tpu.dot_dimension_numbers<[1], [0], [0], [1], [0, 0, 1, 1], [], []>} : vector<8x64xf32>, vector<64x128xf32>, vector<8x128xf32> -> vector<8x128xf32>
    %c0_4 = arith.constant 0 : index
    %c0_5 = arith.constant 0 : index
    %c0_6 = arith.constant 0 : index
    %5 = vector.load %arg3[%c0_4, %c0_5, %c0_6] : memref<6x1x128xf32, #tpu.memory_space<vmem>>, vector<1x1x128xf32>
    %6 = vector.shape_cast %5 : vector<1x1x128xf32> to vector<1x128xf32>
    %7 = vector.broadcast %6 : vector<1x128xf32> to vector<8x128xf32>
    %8 = arith.addf %4, %7 : vector<8x128xf32>
    %cst_7 = arith.constant 5.000000e-01 : f32
    %9 = vector.broadcast %cst_7 : f32 to vector<8x128xf32>
    %10 = arith.mulf %9, %8 : vector<8x128xf32>
    %cst_8 = arith.constant 4.471500e-02 : f32
    %11 = vector.broadcast %cst_8 : f32 to vector<8x128xf32>
    %12 = arith.mulf %11, %8 : vector<8x128xf32>
    %13 = arith.mulf %12, %8 : vector<8x128xf32>
    %14 = arith.mulf %13, %8 : vector<8x128xf32>
    %15 = arith.addf %8, %14 : vector<8x128xf32>
    %cst_9 = arith.constant 0.797884583 : f32
    %16 = vector.broadcast %cst_9 : f32 to vector<8x128xf32>
    %17 = arith.mulf %16, %15 : vector<8x128xf32>
    %18 = math.tanh %17 : vector<8x128xf32>
    %cst_10 = arith.constant 1.000000e+00 : f32
    %19 = vector.broadcast %cst_10 : f32 to vector<8x128xf32>
    %20 = arith.addf %19, %18 : vector<8x128xf32>
    %21 = arith.mulf %10, %20 : vector<8x128xf32>
    %c1 = arith.constant 1 : index
    %c0_11 = arith.constant 0 : index
    %c0_12 = arith.constant 0 : index
    %22 = vector.load %arg2[%c1, %c0_11, %c0_12] : memref<6x128x128xf32, #tpu.memory_space<vmem>>, vector<1x128x128xf32>
    %23 = vector.shape_cast %22 : vector<1x128x128xf32> to vector<128x128xf32>
    %cst_13 = arith.constant dense<0.000000e+00> : vector<8x128xf32>
    %24 = tpu.matmul %21, %23, %cst_13 {dimension_numbers = #tpu.dot_dimension_numbers<[1], [0], [0], [1], [0, 0, 1, 1], [], []>} : vector<8x128xf32>, vector<128x128xf32>, vector<8x128xf32> -> vector<8x128xf32>
    %c1_14 = arith.constant 1 : index
    %c0_15 = arith.constant 0 : index
    %c0_16 = arith.constant 0 : index
    %25 = vector.load %arg3[%c1_14, %c0_15, %c0_16] : memref<6x1x128xf32, #tpu.memory_space<vmem>>, vector<1x1x128xf32>
    %26 = vector.shape_cast %25 : vector<1x1x128xf32> to vector<1x128xf32>
    %27 = vector.broadcast %26 : vector<1x128xf32> to vector<8x128xf32>
    %28 = arith.addf %24, %27 : vector<8x128xf32>
    %cst_17 = arith.constant 5.000000e-01 : f32
    %29 = vector.broadcast %cst_17 : f32 to vector<8x128xf32>
    %30 = arith.mulf %29, %28 : vector<8x128xf32>
    %cst_18 = arith.constant 4.471500e-02 : f32
    %31 = vector.broadcast %cst_18 : f32 to vector<8x128xf32>
    %32 = arith.mulf %31, %28 : vector<8x128xf32>
    %33 = arith.mulf %32, %28 : vector<8x128xf32>
    %34 = arith.mulf %33, %28 : vector<8x128xf32>
    %35 = arith.addf %28, %34 : vector<8x128xf32>
    %cst_19 = arith.constant 0.797884583 : f32
    %36 = vector.broadcast %cst_19 : f32 to vector<8x128xf32>
    %37 = arith.mulf %36, %35 : vector<8x128xf32>
    %38 = math.tanh %37 : vector<8x128xf32>
    %cst_20 = arith.constant 1.000000e+00 : f32
    %39 = vector.broadcast %cst_20 : f32 to vector<8x128xf32>
    %40 = arith.addf %39, %38 : vector<8x128xf32>
    %41 = arith.mulf %30, %40 : vector<8x128xf32>
    %c2 = arith.constant 2 : index
    %c0_21 = arith.constant 0 : index
    %c0_22 = arith.constant 0 : index
    %42 = vector.load %arg2[%c2, %c0_21, %c0_22] : memref<6x128x128xf32, #tpu.memory_space<vmem>>, vector<1x128x128xf32>
    %43 = vector.shape_cast %42 : vector<1x128x128xf32> to vector<128x128xf32>
    %cst_23 = arith.constant dense<0.000000e+00> : vector<8x128xf32>
    %44 = tpu.matmul %41, %43, %cst_23 {dimension_numbers = #tpu.dot_dimension_numbers<[1], [0], [0], [1], [0, 0, 1, 1], [], []>} : vector<8x128xf32>, vector<128x128xf32>, vector<8x128xf32> -> vector<8x128xf32>
    %c2_24 = arith.constant 2 : index
    %c0_25 = arith.constant 0 : index
    %c0_26 = arith.constant 0 : index
    %45 = vector.load %arg3[%c2_24, %c0_25, %c0_26] : memref<6x1x128xf32, #tpu.memory_space<vmem>>, vector<1x1x128xf32>
    %46 = vector.shape_cast %45 : vector<1x1x128xf32> to vector<1x128xf32>
    %47 = vector.broadcast %46 : vector<1x128xf32> to vector<8x128xf32>
    %48 = arith.addf %44, %47 : vector<8x128xf32>
    %cst_27 = arith.constant 5.000000e-01 : f32
    %49 = vector.broadcast %cst_27 : f32 to vector<8x128xf32>
    %50 = arith.mulf %49, %48 : vector<8x128xf32>
    %cst_28 = arith.constant 4.471500e-02 : f32
    %51 = vector.broadcast %cst_28 : f32 to vector<8x128xf32>
    %52 = arith.mulf %51, %48 : vector<8x128xf32>
    %53 = arith.mulf %52, %48 : vector<8x128xf32>
    %54 = arith.mulf %53, %48 : vector<8x128xf32>
    %55 = arith.addf %48, %54 : vector<8x128xf32>
    %cst_29 = arith.constant 0.797884583 : f32
    %56 = vector.broadcast %cst_29 : f32 to vector<8x128xf32>
    %57 = arith.mulf %56, %55 : vector<8x128xf32>
    %58 = math.tanh %57 : vector<8x128xf32>
    %cst_30 = arith.constant 1.000000e+00 : f32
    %59 = vector.broadcast %cst_30 : f32 to vector<8x128xf32>
    %60 = arith.addf %59, %58 : vector<8x128xf32>
    %61 = arith.mulf %50, %60 : vector<8x128xf32>
    %c3 = arith.constant 3 : index
    %c0_31 = arith.constant 0 : index
    %c0_32 = arith.constant 0 : index
    %62 = vector.load %arg2[%c3, %c0_31, %c0_32] : memref<6x128x128xf32, #tpu.memory_space<vmem>>, vector<1x128x128xf32>
    %63 = vector.shape_cast %62 : vector<1x128x128xf32> to vector<128x128xf32>
    %cst_33 = arith.constant dense<0.000000e+00> : vector<8x128xf32>
    %64 = tpu.matmul %61, %63, %cst_33 {dimension_numbers = #tpu.dot_dimension_numbers<[1], [0], [0], [1], [0, 0, 1, 1], [], []>} : vector<8x128xf32>, vector<128x128xf32>, vector<8x128xf32> -> vector<8x128xf32>
    %c3_34 = arith.constant 3 : index
    %c0_35 = arith.constant 0 : index
    %c0_36 = arith.constant 0 : index
    %65 = vector.load %arg3[%c3_34, %c0_35, %c0_36] : memref<6x1x128xf32, #tpu.memory_space<vmem>>, vector<1x1x128xf32>
    %66 = vector.shape_cast %65 : vector<1x1x128xf32> to vector<1x128xf32>
    %67 = vector.broadcast %66 : vector<1x128xf32> to vector<8x128xf32>
    %68 = arith.addf %64, %67 : vector<8x128xf32>
    %cst_37 = arith.constant 5.000000e-01 : f32
    %69 = vector.broadcast %cst_37 : f32 to vector<8x128xf32>
    %70 = arith.mulf %69, %68 : vector<8x128xf32>
    %cst_38 = arith.constant 4.471500e-02 : f32
    %71 = vector.broadcast %cst_38 : f32 to vector<8x128xf32>
    %72 = arith.mulf %71, %68 : vector<8x128xf32>
    %73 = arith.mulf %72, %68 : vector<8x128xf32>
    %74 = arith.mulf %73, %68 : vector<8x128xf32>
    %75 = arith.addf %68, %74 : vector<8x128xf32>
    %cst_39 = arith.constant 0.797884583 : f32
    %76 = vector.broadcast %cst_39 : f32 to vector<8x128xf32>
    %77 = arith.mulf %76, %75 : vector<8x128xf32>
    %78 = math.tanh %77 : vector<8x128xf32>
    %cst_40 = arith.constant 1.000000e+00 : f32
    %79 = vector.broadcast %cst_40 : f32 to vector<8x128xf32>
    %80 = arith.addf %79, %78 : vector<8x128xf32>
    %81 = arith.mulf %70, %80 : vector<8x128xf32>
    %c4 = arith.constant 4 : index
    %c0_41 = arith.constant 0 : index
    %c0_42 = arith.constant 0 : index
    %82 = vector.load %arg2[%c4, %c0_41, %c0_42] : memref<6x128x128xf32, #tpu.memory_space<vmem>>, vector<1x128x128xf32>
    %83 = vector.shape_cast %82 : vector<1x128x128xf32> to vector<128x128xf32>
    %cst_43 = arith.constant dense<0.000000e+00> : vector<8x128xf32>
    %84 = tpu.matmul %81, %83, %cst_43 {dimension_numbers = #tpu.dot_dimension_numbers<[1], [0], [0], [1], [0, 0, 1, 1], [], []>} : vector<8x128xf32>, vector<128x128xf32>, vector<8x128xf32> -> vector<8x128xf32>
    %c4_44 = arith.constant 4 : index
    %c0_45 = arith.constant 0 : index
    %c0_46 = arith.constant 0 : index
    %85 = vector.load %arg3[%c4_44, %c0_45, %c0_46] : memref<6x1x128xf32, #tpu.memory_space<vmem>>, vector<1x1x128xf32>
    %86 = vector.shape_cast %85 : vector<1x1x128xf32> to vector<1x128xf32>
    %87 = vector.broadcast %86 : vector<1x128xf32> to vector<8x128xf32>
    %88 = arith.addf %84, %87 : vector<8x128xf32>
    %cst_47 = arith.constant 5.000000e-01 : f32
    %89 = vector.broadcast %cst_47 : f32 to vector<8x128xf32>
    %90 = arith.mulf %89, %88 : vector<8x128xf32>
    %cst_48 = arith.constant 4.471500e-02 : f32
    %91 = vector.broadcast %cst_48 : f32 to vector<8x128xf32>
    %92 = arith.mulf %91, %88 : vector<8x128xf32>
    %93 = arith.mulf %92, %88 : vector<8x128xf32>
    %94 = arith.mulf %93, %88 : vector<8x128xf32>
    %95 = arith.addf %88, %94 : vector<8x128xf32>
    %cst_49 = arith.constant 0.797884583 : f32
    %96 = vector.broadcast %cst_49 : f32 to vector<8x128xf32>
    %97 = arith.mulf %96, %95 : vector<8x128xf32>
    %98 = math.tanh %97 : vector<8x128xf32>
    %cst_50 = arith.constant 1.000000e+00 : f32
    %99 = vector.broadcast %cst_50 : f32 to vector<8x128xf32>
    %100 = arith.addf %99, %98 : vector<8x128xf32>
    %101 = arith.mulf %90, %100 : vector<8x128xf32>
    %c5 = arith.constant 5 : index
    %c0_51 = arith.constant 0 : index
    %c0_52 = arith.constant 0 : index
    %102 = vector.load %arg2[%c5, %c0_51, %c0_52] : memref<6x128x128xf32, #tpu.memory_space<vmem>>, vector<1x128x128xf32>
    %103 = vector.shape_cast %102 : vector<1x128x128xf32> to vector<128x128xf32>
    %cst_53 = arith.constant dense<0.000000e+00> : vector<8x128xf32>
    %104 = tpu.matmul %101, %103, %cst_53 {dimension_numbers = #tpu.dot_dimension_numbers<[1], [0], [0], [1], [0, 0, 1, 1], [], []>} : vector<8x128xf32>, vector<128x128xf32>, vector<8x128xf32> -> vector<8x128xf32>
    %c5_54 = arith.constant 5 : index
    %c0_55 = arith.constant 0 : index
    %c0_56 = arith.constant 0 : index
    %105 = vector.load %arg3[%c5_54, %c0_55, %c0_56] : memref<6x1x128xf32, #tpu.memory_space<vmem>>, vector<1x1x128xf32>
    %106 = vector.shape_cast %105 : vector<1x1x128xf32> to vector<1x128xf32>
    %107 = vector.broadcast %106 : vector<1x128xf32> to vector<8x128xf32>
    %108 = arith.addf %104, %107 : vector<8x128xf32>
    %c0_57 = arith.constant 0 : index
    %c0_58 = arith.constant 0 : index
    %109 = vector.load %arg4[%c0_57, %c0_58] : memref<8x128xf32, #tpu.memory_space<vmem>>, vector<8x128xf32>
    tpu.vector_store %arg4[%c0_57, %c0_58], %108 {strides = array<i32>} : memref<8x128xf32, #tpu.memory_space<vmem>>, vector<8x128xf32>,
    return
  }
  func.func @transform_0(%arg0: i32) -> (i32, i32) {
    %c0_i32 = arith.constant 0 : i32
    %c0_i32_0 = arith.constant 0 : i32
    return %arg0, %c0_i32 : i32, i32
  }
  func.func @transform_1(%arg0: i32) -> (i32, i32, i32) {
    %c0_i32 = arith.constant 0 : i32
    %c0_i32_0 = arith.constant 0 : i32
    %c0_i32_1 = arith.constant 0 : i32
    %c0_i32_2 = arith.constant 0 : i32
    return %c0_i32, %c0_i32_0, %c0_i32_1 : i32, i32, i32
  }
  func.func @transform_2(%arg0: i32) -> (i32, i32, i32) {
    %c0_i32 = arith.constant 0 : i32
    %c0_i32_0 = arith.constant 0 : i32
    %c0_i32_1 = arith.constant 0 : i32
    %c0_i32_2 = arith.constant 0 : i32
    return %c0_i32, %c0_i32_0, %c0_i32_1 : i32, i32, i32
  }
  func.func @transform_3(%arg0: i32) -> (i32, i32) {
    %c0_i32 = arith.constant 0 : i32
    %c0_i32_0 = arith.constant 0 : i32
    return %arg0, %c0_i32 : i32, i32
  }
}

</mosaic_0001>

<bundles_post_ra>
// kernel: tpu_custom_call.1
= control target key start
LH: loop header
LB: loop body
LE: loop exit
PB: predicated region body
PF: predicated region fallthrough
CT: control target
= control target key end

     0   :  { %8 = vsyncpa [#allocation3], 0  ;;  %s1224_s0 = inlined_call_operand.hbm [shape: f32[8,64], index: 0, kind: input, shape index: {}]   ;;  %s1225_s1 = inlined_call_operand.hbm [shape: f32[6,128,128], index: 1, kind: input, shape index: {}]   ;;  %s1226_s2 = inlined_call_operand.hbm [shape: f32[6,1,128], index: 2, kind: input, shape index: {}]   ;;  %s1227_s3 = inlined_call_operand.hbm [shape: f32[8,128], index: 3, kind: output, shape index: {}]  }
   0x1   :  { %9 = vsyncpa [#allocation6], 0 }
   0x2   :  { %10 = vsyncpa [#allocation4], 0  ;;  %s1082_s12 = smov [#allocation5]  }
   0x3   :  { %s26_s13 = sshll.u32 %s1082_s12, 4  ;;  %s27_s13 = int_to_ptr.vmem [resolvable:$true] %s26_s13 }
   0x4   :  { %s1004_s14 = scalar_lea.vmem %s27_s13, 12288  ;;  %p1009_p1 = scmp.lt.s32.totalorder %s27_s13, %s27_s13 }
   0x5   :  { %p1005_p0 = scmp.ne.s32.totalorder %s27_s13, %s1004_s14  ;;  %p1010_p2 = scmp.lt.s32.totalorder %s1004_s14, %s1004_s14 }
   0x7   :  { %p1011_p3 = por %p1010_p2, %p1009_p1 }
   0x9   :  { %p1012_p4 = pnand %p1011_p3, %p1005_p0 }
   0xb   :  { %1015 = shalt.err (!%p1012_p4)
}
   0xc   :  { %s1083_s15 = smov 128   ;;  %s1084_s16 = smov 8  }
   0xd   :  { %32 = dma.hbm_to_vmem [thread:$0]  %s1225_s1, 12288, %s27_s13, [#allocation6], %s1083_s15, %s1083_s15, %s1084_s16  }
   0xe   :  { %s1085_s19 = smov [#allocation2]   ;;  %s1086_s21 = smov [#allocation7]  }
   0xf   :  { %s17_s20 = sshll.u32 %s1085_s19, 4  ;;  %s38_s22 = sshll.u32 %s1086_s21, 4  ;;  %s18_s20 = int_to_ptr.vmem [resolvable:$true] %s17_s20  ;;  %s39_s22 = int_to_ptr.vmem [resolvable:$true] %s38_s22 }
  0x10   :  { %s1024_s23 = scalar_lea.vmem %s18_s20, 128  ;;  %p1029_p6 = scmp.lt.s32.totalorder %s18_s20, %s18_s20 }
  0x11   :  { %p1025_p5 = scmp.ne.s32.totalorder %s18_s20, %s1024_s23  ;;  %p1030_p7 = scmp.lt.s32.totalorder %s1024_s23, %s1024_s23 }
  0x13   :  { %p1031_p8 = por %p1030_p7, %p1029_p6 }
  0x15   :  { %p1032_p9 = pnand %p1031_p8, %p1025_p5 }
  0x17   :  { %1035 = shalt.err (!%p1032_p9)
}
  0x18   :  { %20 = dma.hbm_to_vmem [thread:$0]  %s1224_s0, 128, %s18_s20, [#allocation3]  }
  0x19   :  { %s1044_s26 = scalar_lea.vmem %s39_s22, 96  ;;  %p1049_p11 = scmp.lt.s32.totalorder %s39_s22, %s39_s22 }
  0x1a   :  { %p1045_p10 = scmp.ne.s32.totalorder %s39_s22, %s1044_s26  ;;  %p1050_p12 = scmp.lt.s32.totalorder %s1044_s26, %s1044_s26 }
  0x1c   :  { %p1051_p13 = por %p1050_p12, %p1049_p11 }
  0x1e   :  { %p1052_p0 = pnand %p1051_p13, %p1045_p10 }
  0x20   :  { %1055 = shalt.err (!%p1052_p0)
}
  0x21   :  { %s1087_s1 = smov 16   ;;  %s1088_s27 = smov 1  }
  0x22   :  { %44 = dma.hbm_to_vmem [thread:$0]  %s1226_s2, 96, %s39_s22, [#allocation6], %s1087_s1, %s1087_s1, %s1088_s27  }
  0x23   :  { %1076 = dma.done.wait [#allocation3], 128  }
  0x24   :  { %1077 = vsyncadd [#allocation3], 4294967168 }
  0x25   :  { %1078 = dma.done.wait [#allocation6], 12384  }
  0x26   :  { %1079 = vsyncadd [#allocation6], 4294954912  ;;  %v1089_v0 = vmov 0.0   ;;  %vm1090_vm0 = vmmov 0   ;;  %v62_v1 = vld [vmem:[#allocation5 + $0x38] sm:$0xff]  ;;  %v61_v2 = vld [vmem:[#allocation5 + $0x30] sm:$0xff] }
  0x27   :  { %782 = vmatprep.subr.mxu0 %v1089_v0  ;;  %798 = vmatprep.mubr.msk.f32.mxu0 %vm1090_vm0, %v1089_v0  ;;  %v60_v3 = vld [vmem:[#allocation5 + $0x28] sm:$0xff]  ;;  %v59_v4 = vld [vmem:[#allocation5 + $0x20] sm:$0xff]  ;;  %v58_v5 = vld [vmem:[#allocation5 + $0x18] sm:$0xff]  ;;  %vm70_vm1 = vcmask 523264   ;;  %s1091_s0 = smov [#allocation8]  }
  0x28   :  { %801 = vmatprep.subr.mxu1 %v1089_v0  ;;  %833 = vmatprep.mubr.msk.f32.mxu1 %vm1090_vm0, %v1089_v0  ;;  %v57_v6 = vld [vmem:[#allocation5 + $0x10] sm:$0xff]  ;;  %v56_v7 = vld [vmem:[#allocation5 + $0x8] sm:$0xff]  ;;  %v55_v8 = vld [vmem:[#allocation5] sm:$0xff]  ;;  %s671_s2 = sshll.u32 %s1091_s0, 4  ;;  %s672_s2 = int_to_ptr.vmem [resolvable:$true] %s671_s2 }
  0x29   :  { %783 = vmatpush3.msra.mxu0 %v62_v1  ;;  %v54_v9 = vld [vmem:[#allocation2] sm:$0xff]  ;;  %v168_v11 = vld [vmem:[#allocation5 + $0xf0] sm:$0xff]  ;;  %v167_v12 = vld [vmem:[#allocation5 + $0xe8] sm:$0xff]  ;;  %s1056_s30 = scalar_lea.vmem %s672_s2, 128  ;;  %p1061_p2 = scmp.lt.s32.totalorder %s672_s2, %s672_s2 }
  0x2a   :  { %784 = vmatprep.subr.mxu0 %v1089_v0  ;;  %v169_v10 = vld [vmem:[#allocation5 + $0xf8] sm:$0xff]  ;;  %v166_v13 = vld [vmem:[#allocation5 + $0xe0] sm:$0xff]  ;;  %v164_v15 = vld [vmem:[#allocation5 + $0xd0] sm:$0xff]  ;;  %p1057_p1 = scmp.ne.s32.totalorder %s672_s2, %s1056_s30  ;;  %p1062_p3 = scmp.lt.s32.totalorder %s1056_s30, %s1056_s30 }
  0x2b   :  { %785 = vmatpush3.msra.mxu0 %v61_v2  ;;  %802 = vmatpush3.msra.mxu1 %v169_v10  ;;  %v165_v14 = vld [vmem:[#allocation5 + $0xd8] sm:$0xff]  ;;  %v163_v16 = vld [vmem:[#allocation5 + $0xc8] sm:$0xff]  ;;  %v162_v17 = vld [vmem:[#allocation5 + $0xc0] sm:$0xff] }
  0x2c   :  { %786 = vmatprep.subr.mxu0 %v1089_v0  ;;  %803 = vmatprep.subr.mxu1 %v1089_v0  ;;  %v161_v18 = vld [vmem:[#allocation5 + $0xb8] sm:$0xff]  ;;  %v160_v19 = vld [vmem:[#allocation5 + $0xb0] sm:$0xff]  ;;  %v159_v20 = vld [vmem:[#allocation5 + $0xa8] sm:$0xff]  ;;  %p1063_p4 = por %p1062_p3, %p1061_p2 }
  0x2d   :  { %787 = vmatpush3.msra.mxu0 %v60_v3  ;;  %804 = vmatpush3.msra.mxu1 %v168_v11  ;;  %v158_v21 = vld [vmem:[#allocation5 + $0xa0] sm:$0xff]  ;;  %v157_v22 = vld [vmem:[#allocation5 + $0x98] sm:$0xff]  ;;  %v156_v23 = vld [vmem:[#allocation5 + $0x90] sm:$0xff] }
  0x2e   :  { %788 = vmatprep.subr.mxu0 %v1089_v0  ;;  %805 = vmatprep.subr.mxu1 %v1089_v0  ;;  %v155_v24 = vld [vmem:[#allocation5 + $0x88] sm:$0xff]  ;;  %v154_v25 = vld [vmem:[#allocation5 + $0x80] sm:$0xff]  ;;  %v273_v39 = vld [vmem:[#allocation5 + $0x178] sm:$0xff]  ;;  %p1064_p5 = pnand %p1063_p4, %p1057_p1 }
  0x2f   :  { %789 = vmatpush3.msra.mxu0 %v59_v4  ;;  %806 = vmatpush3.msra.mxu1 %v167_v12  ;;  %v681_v26 = vld [vmem:[#allocation7] ss:$0 sm:$0xff]  ;;  %v272_v40 = vld [vmem:[#allocation5 + $0x170] sm:$0xff]  ;;  %v271_v41 = vld [vmem:[#allocation5 + $0x168] sm:$0xff] }
  0x30   :  { %790 = vmatprep.subr.mxu0 %v1089_v0  ;;  %807 = vmatprep.subr.mxu1 %v1089_v0  ;;  %v270_v42 = vld [vmem:[#allocation5 + $0x160] sm:$0xff]  ;;  %v269_v43 = vld [vmem:[#allocation5 + $0x158] sm:$0xff]  ;;  %v268_v44 = vld [vmem:[#allocation5 + $0x150] sm:$0xff] }
  0x31   :  { %791 = vmatpush3.msra.mxu0 %v58_v5  ;;  %808 = vmatpush3.msra.mxu1 %v166_v13  ;;  %v267_v45 = vld [vmem:[#allocation5 + $0x148] sm:$0xff]  ;;  %v266_v46 = vld [vmem:[#allocation5 + $0x140] sm:$0xff]  ;;  %v265_v47 = vld [vmem:[#allocation5 + $0x138] sm:$0xff] }
  0x32   :  { %792 = vmatprep.subr.mxu0 %v1089_v0  ;;  %809 = vmatprep.subr.mxu1 %v1089_v0  ;;  %v264_v48 = vld [vmem:[#allocation5 + $0x130] sm:$0xff]  ;;  %v263_v49 = vld [vmem:[#allocation5 + $0x128] sm:$0xff]  ;;  %v262_v50 = vld [vmem:[#allocation5 + $0x120] sm:$0xff] }
  0x33   :  { %793 = vmatpush3.msra.mxu0 %v57_v6  ;;  %810 = vmatpush3.msra.mxu1 %v165_v14  ;;  %v261_v51 = vld [vmem:[#allocation5 + $0x118] sm:$0xff]  ;;  %v260_v52 = vld [vmem:[#allocation5 + $0x110] sm:$0xff]  ;;  %v259_v53 = vld [vmem:[#allocation5 + $0x108] sm:$0xff] }
  0x34   :  { %794 = vmatprep.subr.mxu0 %v1089_v0  ;;  %811 = vmatprep.subr.mxu1 %v1089_v0  ;;  %v258_v54 = vld [vmem:[#allocation5 + $0x100] sm:$0xff]  ;;  %v377_v5 = vld [vmem:[#allocation5 + $0x1f8] sm:$0xff]  ;;  %v376_v6 = vld [vmem:[#allocation5 + $0x1f0] sm:$0xff] }
  0x35   :  { %795 = vmatpush3.msra.mxu0 %v56_v7  ;;  %812 = vmatpush3.msra.mxu1 %v164_v15  ;;  %v683_v55 = vld [vmem:[#allocation7 + $0x1] ss:$0 sm:$0xff]  ;;  %v375_v7 = vld [vmem:[#allocation5 + $0x1e8] sm:$0xff]  ;;  %v372_v10 = vld [vmem:[#allocation5 + $0x1d0] sm:$0xff] }
  0x36   :  { %796 = vmatprep.subr.mxu0 %v1089_v0  ;;  %813 = vmatprep.subr.mxu1 %v1089_v0  ;;  %v371_v11 = vld [vmem:[#allocation5 + $0x1c8] sm:$0xff]  ;;  %v370_v12 = vld [vmem:[#allocation5 + $0x1c0] sm:$0xff]  ;;  %v369_v13 = vld [vmem:[#allocation5 + $0x1b8] sm:$0xff] }
  0x37   :  { %797 = vmatpush3.msra.mxu0 %v55_v8  ;;  %814 = vmatpush3.msra.mxu1 %v163_v16  ;;  %v374_v8 = vld [vmem:[#allocation5 + $0x1e0] sm:$0xff]  ;;  %v368_v14 = vld [vmem:[#allocation5 + $0x1b0] sm:$0xff]  ;;  %v367_v15 = vld [vmem:[#allocation5 + $0x1a8] sm:$0xff] }
  0x38   :  { %799 = vmatmul.mubr.msk.f32.vlgmr.msra.gmra.mxu0 %vm70_vm1, %v54_v9  ;;  %836 = vmatprep.subr.mxu0 %v1089_v0  ;;  %v373_v9 = vld [vmem:[#allocation5 + $0x1d8] sm:$0xff]  ;;  %v366_v16 = vld [vmem:[#allocation5 + $0x1a0] sm:$0xff] }
  0x39   :  { %868 = vmatprep.mubr.msk.f32.mxu0 %vm1090_vm0, %v1089_v0  ;;  %815 = vmatprep.subr.mxu1 %v1089_v0 }
  0x3a   :  { %816 = vmatpush3.msra.mxu1 %v162_v17  ;;  %837 = vmatpush3.msra.mxu0 %v273_v39  ;;  %v365_v17 = vld [vmem:[#allocation5 + $0x198] sm:$0xff]  ;;  %v476_v39 = vld [vmem:[#allocation5 + $0x250] sm:$0xff] }
  0x3b   :  { %817 = vmatprep.subr.mxu1 %v1089_v0  ;;  %838 = vmatprep.subr.mxu0 %v1089_v0 }
  0x3c   :  { %818 = vmatpush3.msra.mxu1 %v161_v18  ;;  %839 = vmatpush3.msra.mxu0 %v272_v40  ;;  %v364_v18 = vld [vmem:[#allocation5 + $0x190] sm:$0xff]  ;;  %v475_v40 = vld [vmem:[#allocation5 + $0x248] sm:$0xff] }
  0x3d   :  { %819 = vmatprep.subr.mxu1 %v1089_v0  ;;  %840 = vmatprep.subr.mxu0 %v1089_v0 }
  0x3e   :  { %820 = vmatpush3.msra.mxu1 %v160_v19  ;;  %841 = vmatpush3.msra.mxu0 %v271_v41  ;;  %v363_v19 = vld [vmem:[#allocation5 + $0x188] sm:$0xff]  ;;  %v474_v41 = vld [vmem:[#allocation5 + $0x240] sm:$0xff] }
  0x3f   :  { %821 = vmatprep.subr.mxu1 %v1089_v0  ;;  %842 = vmatprep.subr.mxu0 %v1089_v0 }
  0x40   :  { %822 = vmatpush3.msra.mxu1 %v159_v20  ;;  %843 = vmatpush3.msra.mxu0 %v270_v42  ;;  %v362_v20 = vld [vmem:[#allocation5 + $0x180] sm:$0xff]  ;;  %v473_v42 = vld [vmem:[#allocation5 + $0x238] sm:$0xff] }
  0x41   :  { %823 = vmatprep.subr.mxu1 %v1089_v0  ;;  %844 = vmatprep.subr.mxu0 %v1089_v0 }
  0x42   :  { %824 = vmatpush3.msra.mxu1 %v158_v21  ;;  %845 = vmatpush3.msra.mxu0 %v269_v43  ;;  %v684_v21 = vld [vmem:[#allocation7 + $0x2] ss:$0 sm:$0xff]  ;;  %v472_v43 = vld [vmem:[#allocation5 + $0x230] sm:$0xff] }
  0x43   :  { %825 = vmatprep.subr.mxu1 %v1089_v0  ;;  %846 = vmatprep.subr.mxu0 %v1089_v0 }
  0x44   :  { %826 = vmatpush3.msra.mxu1 %v157_v22  ;;  %847 = vmatpush3.msra.mxu0 %v268_v44  ;;  %v471_v44 = vld [vmem:[#allocation5 + $0x228] sm:$0xff] }
  0x45   :  { %827 = vmatprep.subr.mxu1 %v1089_v0  ;;  %848 = vmatprep.subr.mxu0 %v1089_v0 }
  0x46   :  { %828 = vmatpush3.msra.mxu1 %v156_v23  ;;  %849 = vmatpush3.msra.mxu0 %v267_v45  ;;  %v470_v45 = vld [vmem:[#allocation5 + $0x220] sm:$0xff] }
  0x47   :  { %829 = vmatprep.subr.mxu1 %v1089_v0  ;;  %850 = vmatprep.subr.mxu0 %v1089_v0 }
  0x48   :  { %830 = vmatpush3.msra.mxu1 %v155_v24  ;;  %851 = vmatpush3.msra.mxu0 %v266_v46  ;;  %v469_v46 = vld [vmem:[#allocation5 + $0x218] sm:$0xff] }
  0x49   :  { %831 = vmatprep.subr.mxu1 %v1089_v0  ;;  %852 = vmatprep.subr.mxu0 %v1089_v0 }
  0x4a   :  { %832 = vmatpush3.msra.mxu1 %v154_v25  ;;  %853 = vmatpush3.msra.mxu0 %v265_v47  ;;  %v468_v47 = vld [vmem:[#allocation5 + $0x210] sm:$0xff] }
  0x4b   :  { %871 = vmatprep.subr.mxu1 %v1089_v0  ;;  %854 = vmatprep.subr.mxu0 %v1089_v0 }
  0x4c   :  { %855 = vmatpush3.msra.mxu0 %v264_v48  ;;  %v467_v48 = vld [vmem:[#allocation5 + $0x208] sm:$0xff] }
  0x4d   :  { %856 = vmatprep.subr.mxu0 %v1089_v0 }
  0x4e   :  { %857 = vmatpush3.msra.mxu0 %v263_v49  ;;  %v466_v49 = vld [vmem:[#allocation5 + $0x200] sm:$0xff] }
  0x4f   :  { %858 = vmatprep.subr.mxu0 %v1089_v0 }
  0x50   :  { %859 = vmatpush3.msra.mxu0 %v262_v50  ;;  %v685_v50 = vld [vmem:[#allocation7 + $0x3] ss:$0 sm:$0xff] }
  0x51   :  { %860 = vmatprep.subr.mxu0 %v1089_v0 }
  0x52   :  { %861 = vmatpush3.msra.mxu0 %v261_v51 }
  0x53   :  { %862 = vmatprep.subr.mxu0 %v1089_v0 }
  0x54   :  { %863 = vmatpush3.msra.mxu0 %v260_v52 }
  0x55   :  { %864 = vmatprep.subr.mxu0 %v1089_v0 }
  0x56   :  { %865 = vmatpush3.msra.mxu0 %v259_v53 }
  0x57   :  { %866 = vmatprep.subr.mxu0 %v1089_v0 }
  0x58   :  { %867 = vmatpush3.msra.mxu0 %v258_v54 }
  0x59   :  { %906 = vmatprep.subr.mxu0 %v1089_v0 }
  0xf8   :  { %v140_v27 = vpop.f32.mrf.mxu0 }
  0xf9   :  { %v141_v28 = vadd.f32 %v681_v26, %v140_v27 }
  0xfa   :  { %v800_v29 = vpop.f32.mrf.mxu0 }
  0xfb   :  { %v145_v30 = vmul.f32 0.044715, %v141_v28  ;;  %v144_v36 = vmul.f32 0.5, %v141_v28 }
  0xfd   :  { %v146_v31 = vmul.f32 %v145_v30, %v141_v28 }
  0xff   :  { %v147_v32 = vmul.f32 %v146_v31, %v141_v28 }
 0x101   :  { %v148_v33 = vadd.f32 %v147_v32, %v141_v28 }
 0x103   :  { %v149_v34 = vmul.f32 0.7978846, %v148_v33 }
 0x105   :  { %986 = vtanh.f32 %v149_v34  ;;  %v481_v34 = vld [vmem:[#allocation5 + $0x278] sm:$0xff] }
 0x112   :  { %v987_v35 = vpop.eup %986 }
 0x113   :  { %v151_v37 = vadd.f32 1.0, %v987_v35  ;;  %v480_v35 = vld [vmem:[#allocation5 + $0x270] sm:$0xff] }
 0x115   :  { %v152_v38 = vmul.f32 %v151_v37, %v144_v36  ;;  %v479_v36 = vld [vmem:[#allocation5 + $0x268] sm:$0xff]  ;;  %v478_v37 = vld [vmem:[#allocation5 + $0x260] sm:$0xff] }
 0x117   :  { %834 = vmatmul.mubr.f32.vlgmr.msra.gmra.mxu1 %v152_v38  ;;  %v477_v38 = vld [vmem:[#allocation5 + $0x258] sm:$0xff] }
 0x118   :  { %903 = vmatprep.mubr.msk.f32.mxu1 %vm1090_vm0, %v1089_v0  ;;  %872 = vmatpush3.msra.mxu1 %v377_v5  ;;  %v580_v5 = vld [vmem:[#allocation5 + $0x2d0] sm:$0xff] }
 0x119   :  { %873 = vmatprep.subr.mxu1 %v1089_v0 }
 0x11a   :  { %874 = vmatpush3.msra.mxu1 %v376_v6  ;;  %v579_v6 = vld [vmem:[#allocation5 + $0x2c8] sm:$0xff] }
 0x11b   :  { %875 = vmatprep.subr.mxu1 %v1089_v0 }
 0x11c   :  { %876 = vmatpush3.msra.mxu1 %v375_v7  ;;  %v578_v7 = vld [vmem:[#allocation5 + $0x2c0] sm:$0xff] }
 0x11d   :  { %877 = vmatprep.subr.mxu1 %v1089_v0 }
 0x11e   :  { %878 = vmatpush3.msra.mxu1 %v374_v8  ;;  %v577_v8 = vld [vmem:[#allocation5 + $0x2b8] sm:$0xff] }
 0x11f   :  { %879 = vmatprep.subr.mxu1 %v1089_v0 }
 0x120   :  { %880 = vmatpush3.msra.mxu1 %v373_v9  ;;  %v576_v9 = vld [vmem:[#allocation5 + $0x2b0] sm:$0xff] }
 0x121   :  { %881 = vmatprep.subr.mxu1 %v1089_v0 }
 0x122   :  { %882 = vmatpush3.msra.mxu1 %v372_v10  ;;  %v575_v10 = vld [vmem:[#allocation5 + $0x2a8] sm:$0xff] }
 0x123   :  { %883 = vmatprep.subr.mxu1 %v1089_v0 }
 0x124   :  { %884 = vmatpush3.msra.mxu1 %v371_v11  ;;  %v574_v11 = vld [vmem:[#allocation5 + $0x2a0] sm:$0xff] }
 0x125   :  { %885 = vmatprep.subr.mxu1 %v1089_v0 }
 0x126   :  { %886 = vmatpush3.msra.mxu1 %v370_v12  ;;  %v573_v12 = vld [vmem:[#allocation5 + $0x298] sm:$0xff] }
 0x127   :  { %887 = vmatprep.subr.mxu1 %v1089_v0 }
 0x128   :  { %888 = vmatpush3.msra.mxu1 %v369_v13  ;;  %v572_v13 = vld [vmem:[#allocation5 + $0x290] sm:$0xff] }
 0x129   :  { %889 = vmatprep.subr.mxu1 %v1089_v0 }
 0x12a   :  { %890 = vmatpush3.msra.mxu1 %v368_v14  ;;  %v571_v14 = vld [vmem:[#allocation5 + $0x288] sm:$0xff] }
 0x12b   :  { %891 = vmatprep.subr.mxu1 %v1089_v0 }
 0x12c   :  { %892 = vmatpush3.msra.mxu1 %v367_v15  ;;  %v570_v15 = vld [vmem:[#allocation5 + $0x280] sm:$0xff] }
 0x12d   :  { %893 = vmatprep.subr.mxu1 %v1089_v0 }
 0x12e   :  { %894 = vmatpush3.msra.mxu1 %v366_v16  ;;  %v686_v16 = vld [vmem:[#allocation7 + $0x4] ss:$0 sm:$0xff] }
 0x12f   :  { %895 = vmatprep.subr.mxu1 %v1089_v0 }
 0x130   :  { %896 = vmatpush3.msra.mxu1 %v365_v17 }
 0x131   :  { %897 = vmatprep.subr.mxu1 %v1089_v0 }
 0x132   :  { %898 = vmatpush3.msra.mxu1 %v364_v18 }
 0x133   :  { %899 = vmatprep.subr.mxu1 %v1089_v0 }
 0x134   :  { %900 = vmatpush3.msra.mxu1 %v363_v19 }
 0x135   :  { %901 = vmatprep.subr.mxu1 %v1089_v0 }
 0x136   :  { %902 = vmatpush3.msra.mxu1 %v362_v20 }
 0x137   :  { %941 = vmatprep.subr.mxu1 %v1089_v0 }
 0x1d7   :  { %v244_v56 = vpop.f32.mrf.mxu1 }
 0x1d8   :  { %v245_v57 = vadd.f32 %v683_v55, %v244_v56 }
 0x1d9   :  { %v835_v58 = vpop.f32.mrf.mxu1 }
 0x1da   :  { %v249_v59 = vmul.f32 0.044715, %v245_v57  ;;  %v248_v2 = vmul.f32 0.5, %v245_v57 }
 0x1dc   :  { %v250_v60 = vmul.f32 %v249_v59, %v245_v57 }
 0x1de   :  { %v251_v61 = vmul.f32 %v250_v60, %v245_v57 }
 0x1e0   :  { %v252_v62 = vadd.f32 %v251_v61, %v245_v57 }
 0x1e2   :  { %v253_v63 = vmul.f32 0.7978846, %v252_v62 }
 0x1e4   :  { %988 = vtanh.f32 %v253_v63  ;;  %v585_v63 = vld [vmem:[#allocation5 + $0x2f8] sm:$0xff] }
 0x1f1   :  { %v989_v1 = vpop.eup %988 }
 0x1f2   :  { %v255_v3 = vadd.f32 1.0, %v989_v1  ;;  %v584_v1 = vld [vmem:[#allocation5 + $0x2f0] sm:$0xff] }
 0x1f4   :  { %v256_v4 = vmul.f32 %v255_v3, %v248_v2  ;;  %v583_v2 = vld [vmem:[#allocation5 + $0x2e8] sm:$0xff]  ;;  %v582_v3 = vld [vmem:[#allocation5 + $0x2e0] sm:$0xff] }
 0x1f6   :  { %869 = vmatmul.mubr.f32.vlgmr.msra.gmra.mxu0 %v256_v4  ;;  %v581_v4 = vld [vmem:[#allocation5 + $0x2d8] sm:$0xff] }
 0x1f7   :  { %938 = vmatprep.mubr.msk.f32.mxu0 %vm1090_vm0, %v1089_v0  ;;  %907 = vmatpush3.msra.mxu0 %v481_v34 }
 0x1f8   :  { %908 = vmatprep.subr.mxu0 %v1089_v0 }
 0x1f9   :  { %909 = vmatpush3.msra.mxu0 %v480_v35 }
 0x1fa   :  { %910 = vmatprep.subr.mxu0 %v1089_v0 }
 0x1fb   :  { %911 = vmatpush3.msra.mxu0 %v479_v36 }
 0x1fc   :  { %912 = vmatprep.subr.mxu0 %v1089_v0 }
 0x1fd   :  { %913 = vmatpush3.msra.mxu0 %v478_v37 }
 0x1fe   :  { %914 = vmatprep.subr.mxu0 %v1089_v0 }
 0x1ff   :  { %915 = vmatpush3.msra.mxu0 %v477_v38 }
 0x200   :  { %916 = vmatprep.subr.mxu0 %v1089_v0 }
 0x201   :  { %917 = vmatpush3.msra.mxu0 %v476_v39 }
 0x202   :  { %918 = vmatprep.subr.mxu0 %v1089_v0 }
 0x203   :  { %919 = vmatpush3.msra.mxu0 %v475_v40 }
 0x204   :  { %920 = vmatprep.subr.mxu0 %v1089_v0 }
 0x205   :  { %921 = vmatpush3.msra.mxu0 %v474_v41 }
 0x206   :  { %922 = vmatprep.subr.mxu0 %v1089_v0 }
 0x207   :  { %923 = vmatpush3.msra.mxu0 %v473_v42 }
 0x208   :  { %924 = vmatprep.subr.mxu0 %v1089_v0 }
 0x209   :  { %925 = vmatpush3.msra.mxu0 %v472_v43 }
 0x20a   :  { %926 = vmatprep.subr.mxu0 %v1089_v0 }
 0x20b   :  { %927 = vmatpush3.msra.mxu0 %v471_v44 }
 0x20c   :  { %928 = vmatprep.subr.mxu0 %v1089_v0 }
 0x20d   :  { %929 = vmatpush3.msra.mxu0 %v470_v45 }
 0x20e   :  { %930 = vmatprep.subr.mxu0 %v1089_v0 }
 0x20f   :  { %931 = vmatpush3.msra.mxu0 %v469_v46 }
 0x210   :  { %932 = vmatprep.subr.mxu0 %v1089_v0 }
 0x211   :  { %933 = vmatpush3.msra.mxu0 %v468_v47 }
 0x212   :  { %934 = vmatprep.subr.mxu0 %v1089_v0 }
 0x213   :  { %935 = vmatpush3.msra.mxu0 %v467_v48 }
 0x214   :  { %936 = vmatprep.subr.mxu0 %v1089_v0 }
 0x215   :  { %937 = vmatpush3.msra.mxu0 %v466_v49 }
 0x2b6   :  { %v348_v22 = vpop.f32.mrf.mxu0 }
 0x2b7   :  { %v349_v23 = vadd.f32 %v684_v21, %v348_v22 }
 0x2b8   :  { %v870_v24 = vpop.f32.mrf.mxu0 }
 0x2b9   :  { %v353_v25 = vmul.f32 0.044715, %v349_v23  ;;  %v352_v31 = vmul.f32 0.5, %v349_v23 }
 0x2bb   :  { %v354_v26 = vmul.f32 %v353_v25, %v349_v23 }
 0x2bd   :  { %v355_v27 = vmul.f32 %v354_v26, %v349_v23 }
 0x2bf   :  { %v356_v28 = vadd.f32 %v355_v27, %v349_v23 }
 0x2c1   :  { %v357_v29 = vmul.f32 0.7978846, %v356_v28 }
 0x2c3   :  { %990 = vtanh.f32 %v357_v29  ;;  %v687_v29 = vld [vmem:[#allocation7 + $0x5] ss:$0 sm:$0xff] }
 0x2d0   :  { %v991_v30 = vpop.eup %990 }
 0x2d1   :  { %v359_v32 = vadd.f32 1.0, %v991_v30 }
 0x2d3   :  { %v360_v33 = vmul.f32 %v359_v32, %v352_v31 }
 0x2d5   :  { %904 = vmatmul.mubr.f32.vlgmr.msra.gmra.mxu1 %v360_v33 }
 0x2d6   :  { %973 = vmatprep.mubr.msk.f32.mxu1 %vm1090_vm0, %v1089_v0  ;;  %942 = vmatpush3.msra.mxu1 %v585_v63 }
 0x2d7   :  { %943 = vmatprep.subr.mxu1 %v1089_v0 }
 0x2d8   :  { %944 = vmatpush3.msra.mxu1 %v584_v1 }
 0x2d9   :  { %945 = vmatprep.subr.mxu1 %v1089_v0 }
 0x2da   :  { %946 = vmatpush3.msra.mxu1 %v583_v2 }
 0x2db   :  { %947 = vmatprep.subr.mxu1 %v1089_v0 }
 0x2dc   :  { %948 = vmatpush3.msra.mxu1 %v582_v3 }
 0x2dd   :  { %949 = vmatprep.subr.mxu1 %v1089_v0 }
 0x2de   :  { %950 = vmatpush3.msra.mxu1 %v581_v4 }
 0x2df   :  { %951 = vmatprep.subr.mxu1 %v1089_v0 }
 0x2e0   :  { %952 = vmatpush3.msra.mxu1 %v580_v5 }
 0x2e1   :  { %953 = vmatprep.subr.mxu1 %v1089_v0 }
 0x2e2   :  { %954 = vmatpush3.msra.mxu1 %v579_v6 }
 0x2e3   :  { %955 = vmatprep.subr.mxu1 %v1089_v0 }
 0x2e4   :  { %956 = vmatpush3.msra.mxu1 %v578_v7 }
 0x2e5   :  { %957 = vmatprep.subr.mxu1 %v1089_v0 }
 0x2e6   :  { %958 = vmatpush3.msra.mxu1 %v577_v8 }
 0x2e7   :  { %959 = vmatprep.subr.mxu1 %v1089_v0 }
 0x2e8   :  { %960 = vmatpush3.msra.mxu1 %v576_v9 }
 0x2e9   :  { %961 = vmatprep.subr.mxu1 %v1089_v0 }
 0x2ea   :  { %962 = vmatpush3.msra.mxu1 %v575_v10 }
 0x2eb   :  { %963 = vmatprep.subr.mxu1 %v1089_v0 }
 0x2ec   :  { %964 = vmatpush3.msra.mxu1 %v574_v11 }
 0x2ed   :  { %965 = vmatprep.subr.mxu1 %v1089_v0 }
 0x2ee   :  { %966 = vmatpush3.msra.mxu1 %v573_v12 }
 0x2ef   :  { %967 = vmatprep.subr.mxu1 %v1089_v0 }
 0x2f0   :  { %968 = vmatpush3.msra.mxu1 %v572_v13 }
 0x2f1   :  { %969 = vmatprep.subr.mxu1 %v1089_v0 }
 0x2f2   :  { %970 = vmatpush3.msra.mxu1 %v571_v14 }
 0x2f3   :  { %971 = vmatprep.subr.mxu1 %v1089_v0 }
 0x2f4   :  { %972 = vmatpush3.msra.mxu1 %v570_v15 }
 0x395   :  { %v452_v51 = vpop.f32.mrf.mxu1 }
 0x396   :  { %v453_v52 = vadd.f32 %v685_v50, %v452_v51 }
 0x397   :  { %v905_v53 = vpop.f32.mrf.mxu1 }
 0x398   :  { %v457_v54 = vmul.f32 0.044715, %v453_v52  ;;  %v456_v60 = vmul.f32 0.5, %v453_v52 }
 0x39a   :  { %v458_v55 = vmul.f32 %v457_v54, %v453_v52 }
 0x39c   :  { %v459_v56 = vmul.f32 %v458_v55, %v453_v52 }
 0x39e   :  { %v460_v57 = vadd.f32 %v459_v56, %v453_v52 }
 0x3a0   :  { %v461_v58 = vmul.f32 0.7978846, %v460_v57 }
 0x3a2   :  { %992 = vtanh.f32 %v461_v58 }
 0x3af   :  { %v993_v59 = vpop.eup %992 }
 0x3b0   :  { %v463_v61 = vadd.f32 1.0, %v993_v59 }
 0x3b2   :  { %v464_v62 = vmul.f32 %v463_v61, %v456_v60 }
 0x3b4   :  { %939 = vmatmul.mubr.f32.vlgmr.msra.gmra.mxu0 %v464_v62 }
 0x474   :  { %v556_v17 = vpop.f32.mrf.mxu0 }
 0x475   :  { %v557_v18 = vadd.f32 %v686_v16, %v556_v17 }
 0x476   :  { %v940_v19 = vpop.f32.mrf.mxu0 }
 0x477   :  { %v561_v20 = vmul.f32 0.044715, %v557_v18  ;;  %v560_v26 = vmul.f32 0.5, %v557_v18 }
 0x479   :  { %v562_v21 = vmul.f32 %v561_v20, %v557_v18 }
 0x47b   :  { %v563_v22 = vmul.f32 %v562_v21, %v557_v18 }
 0x47d   :  { %v564_v23 = vadd.f32 %v563_v22, %v557_v18 }
 0x47f   :  { %v565_v24 = vmul.f32 0.7978846, %v564_v23 }
 0x481   :  { %994 = vtanh.f32 %v565_v24 }
 0x48e   :  { %v995_v25 = vpop.eup %994 }
 0x48f   :  { %v567_v27 = vadd.f32 1.0, %v995_v25 }
 0x491   :  { %v568_v28 = vmul.f32 %v567_v27, %v560_v26 }
 0x493   :  { %974 = vmatmul.mubr.f32.vlgmr.msra.gmra.mxu1 %v568_v28 }
 0x553   :  { %v660_v0 = vpop.f32.mrf.mxu1 }
 0x554   :  { %v661_v30 = vadd.f32 %v687_v29, %v660_v0 }
 0x555   :  { %v975_v31 = vpop.f32.mrf.mxu1 }
 0x556   :  { %664 = vst [vmem:[#allocation8] sm:$0xff] %v661_v30 }
 0x557   :  { %1067 = shalt.err (!%p1064_p5)
}
 0x558   :  { %674 = dma.vmem_to_hbm [thread:$0]  %s672_s2, 128, %s1227_s3, [#allocation4]  }
 0x559   :  { %1080 = dma.done.wait [#allocation4], 128  }
 0x55a   :  { %1081 = vsyncadd [#allocation4], 4294967168 }
 0x55b   :  { %678 = vsyncpa [#allocation3], 1 }
 0x55c   :  { %679 = vsyncpa [#allocation6], 1 }
 0x55d   :  { %680 = vsyncpa [#allocation4], 1 }

</bundles_post_ra>
